<compile_context>
chip_gen: v6e
topology: v6e:2x2x1
jax: 0.10.0
libtpu: 0.0.40
codegen_flags: <defaults>
</compile_context>

<pallas_src>
import jax
import jax.numpy as jnp
from jax.experimental import pallas as pl
from jax.experimental.pallas import tpu as pltpu

LANE = 128
SUBLANE = 8
NEG_INF = -1e30


def _round_up(n, m):
    return (n + m - 1) // m * m


def policynet_kernel(x_ref, w1_ref, b1_ref, w2_ref, b2_ref, w3_ref, b3_ref,
                     out_ref):
    bf16 = jnp.bfloat16
    # fc1 + relu  (bf16 MXU inputs, f32 accumulate, f32 elementwise)
    h = jnp.dot(x_ref[...].astype(bf16), w1_ref[...],
                preferred_element_type=jnp.float32)
    h = jnp.maximum(h + b1_ref[...], 0.0)
    # h_1 + relu
    h = jnp.dot(h.astype(bf16), w2_ref[...],
                preferred_element_type=jnp.float32)
    h = jnp.maximum(h + b2_ref[...], 0.0)
    # fc2 -> logits; b3's padded lanes carry -1e30 so padded actions are
    # masked "for free" (padded w3 columns are exact zeros).
    logits = jnp.dot(h.astype(bf16), w3_ref[...],
                     preferred_element_type=jnp.float32)
    logits = logits + b3_ref[...]

    # Numerically stable softmax over the action (lane) axis, all f32.
    m = jnp.max(logits, axis=-1, keepdims=True)
    e = jnp.exp(logits - m)
    denom = jnp.sum(e, axis=-1, keepdims=True)
    out_ref[...] = (e * pl.reciprocal(denom, approx=True)).astype(out_ref.dtype)


def prepare_params(params):
    """One-time padding / casting of PolicyNet params for the Pallas kernel.

    Call once (e.g. after init or a weight update); reuse the result for every
    forward call.  Weights -> bf16, lane-padded to multiples of 128 on output
    dims (x's feature dim stays unpadded so w1 keeps K == state_dim).
    Biases -> f32; b3's padded action lanes are set to -1e30."""
    w1, b1, w2, b2, w3, b3 = (params["w1"], params["b1"], params["w2"],
                              params["b2"], params["w3"], params["b3"])
    state_dim, hidden_dim = w1.shape
    action_dim = w3.shape[1]
    H = _round_up(hidden_dim, LANE)
    A = _round_up(action_dim, LANE)
    bf16, f32 = jnp.bfloat16, jnp.float32

    def pad2(a, rows, cols, value=0.0):
        return jnp.pad(a, ((0, rows - a.shape[0]), (0, cols - a.shape[1])),
                       constant_values=value)

    return {
        "w1": pad2(w1.astype(f32), state_dim, H).astype(bf16),
        "b1": pad2(b1.astype(f32), 1, H),
        "w2": pad2(w2.astype(f32), H, H).astype(bf16),
        "b2": pad2(b2.astype(f32), 1, H),
        "w3": pad2(w3.astype(f32), H, A).astype(bf16),
        "b3": pad2(b3.astype(f32), 1, A, value=NEG_INF),
        "state_dim": state_dim,
        "hidden_dim": hidden_dim,
        "action_dim": action_dim,
    }


def policy_net_forward(x, prepped, *, tile_b=1024):
    """x: [B, state_dim] float32.  prepped: output of prepare_params().

    Returns softmax action probabilities [B, action_dim] (float32)."""
    B, state_dim = x.shape
    assert state_dim == prepped["state_dim"], "state_dim mismatch"
    action_dim = prepped["action_dim"]
    w1, b1, w2, b2, w3, b3 = (prepped["w1"], prepped["b1"], prepped["w2"],
                              prepped["b2"], prepped["w3"], prepped["b3"])
    H = w2.shape[0]
    A = w3.shape[1]

    # Batch tile: size TB so that Bp padding is minimal while amortizing the
    # ~0.35us per-grid-step overhead (large TB), sublane (8) aligned.
    num_tiles_target = pl.cdiv(B, tile_b)
    TB = _round_up(pl.cdiv(B, num_tiles_target), SUBLANE)
    num_tiles = pl.cdiv(B, TB)
    Bp = num_tiles * TB

    xp = x.astype(jnp.float32)
    if Bp != B:
        xp = jnp.pad(xp, ((0, Bp - B), (0, 0)))

    # Weights / biases: constant index map -> VMEM resident across grid steps.
    const = lambda a: pl.BlockSpec(a.shape, lambda i: (0,) * a.ndim)

    flops = 2 * Bp * (state_dim * H + H * H + H * A)
    transcendentals = Bp * (A + 1)  # exp lanes + reciprocal per row
    bytes_accessed = (4 * xp.size + 4 * Bp * A
                      + 2 * (w1.size + w2.size + w3.size)
                      + 4 * (b1.size + b2.size + b3.size))

    out_padded = pl.pallas_call(
        policynet_kernel,
        out_shape=jax.ShapeDtypeStruct((Bp, A), jnp.float32),
        grid=(num_tiles,),
        in_specs=[
            # x tiled along batch; feature dim left unpadded (== full array dim).
            pl.BlockSpec((TB, state_dim), lambda i: (i, 0)),
            const(w1), const(b1),
            const(w2), const(b2),
            const(w3), const(b3),
        ],
        out_specs=pl.BlockSpec((TB, A), lambda i: (i, 0)),
        compiler_params=pltpu.CompilerParams(
            # TODO(synk): benchmark pltpu.CORE_PARALLEL on v7x (2 TensorCores).
            dimension_semantics=("parallel",),
            vmem_limit_bytes=32 * 1024 * 1024),
        cost_estimate=pl.CostEstimate(
            flops=flops,
            transcendentals=transcendentals,
            bytes_accessed=bytes_accessed),
    )(xp, w1, b1, w2, b2, w3, b3)

    # Slice padded batch rows / action lanes back off.
    return out_padded[:B, :action_dim]


def init_params(key, state_dim, hidden_dim, action_dim):
    """Deterministic init mimicking torch.nn.Linear (uniform +/- 1/sqrt(fan_in))."""
    def linear(k, fan_in, fan_out):
        kw, kb = jax.random.split(k)
        bound = 1.0 / jnp.sqrt(fan_in)
        w = jax.random.uniform(kw, (fan_in, fan_out), jnp.float32, -bound, bound)
        b = jax.random.uniform(kb, (1, fan_out), jnp.float32, -bound, bound)
        return w, b

    k1, k2, k3 = jax.random.split(key, 3)
    w1, b1 = linear(k1, state_dim, hidden_dim)
    w2, b2 = linear(k2, hidden_dim, hidden_dim)
    w3, b3 = linear(k3, hidden_dim, action_dim)
    return {"w1": w1, "b1": b1, "w2": w2, "b2": b2, "w3": w3, "b3": b3}


def reference_forward(x, p, matmul_dtype=jnp.float32):
    def dot(a, b):
        return jnp.dot(a.astype(matmul_dtype), b.astype(matmul_dtype),
                       preferred_element_type=jnp.float32)
    h = jax.nn.relu(dot(x, p["w1"]) + p["b1"])
    h = jax.nn.relu(dot(h, p["w2"]) + p["b2"])
    return jax.nn.softmax(dot(h, p["w3"]) + p["b3"], axis=1)


if __name__ == "__main__":
    state_dim, hidden_dim, action_dim = 16, 32, 4
    batch = 8

    key = jax.random.PRNGKey(0)
    kx, kp = jax.random.split(key)
    x = jax.random.normal(kx, (batch, state_dim), jnp.float32)
    params = init_params(kp, state_dim, hidden_dim, action_dim)
    prepped = prepare_params(params)

    out = jax.block_until_ready(policy_net_forward(x, prepped))

    ref_bf16 = reference_forward(x, params, matmul_dtype=jnp.bfloat16)
    ref_f32 = reference_forward(x, params, matmul_dtype=jnp.float32)

    assert out.shape == (batch, action_dim)
    assert jnp.allclose(out.sum(axis=1), 1.0, atol=5e-3), "softmax rows must sum to 1"
    assert jnp.allclose(out, ref_bf16, atol=1e-2), "mismatch vs bf16-matmul reference"
    assert jnp.allclose(out, ref_f32, atol=5e-2), "mismatch vs f32 reference"

    print("KERNEL_OK")
</pallas_src>

<mosaic_0001>
module attributes {stable_mosaic.version = 11 : i64} {
  func.func @policynet_kernel(%arg0: i32, %arg1: memref<8x16xf32, #tpu.memory_space<vmem>>, %arg2: memref<16x128xbf16, #tpu.memory_space<vmem>>, %arg3: memref<1x128xf32, #tpu.memory_space<vmem>>, %arg4: memref<128x128xbf16, #tpu.memory_space<vmem>>, %arg5: memref<1x128xf32, #tpu.memory_space<vmem>>, %arg6: memref<128x128xbf16, #tpu.memory_space<vmem>>, %arg7: memref<1x128xf32, #tpu.memory_space<vmem>>, %arg8: memref<8x128xf32, #tpu.memory_space<vmem>>) attributes {dimension_semantics = [#tpu.dimension_semantics<parallel>], iteration_bounds = array<i64: 1>, scalar_prefetch = 0 : i64, scratch_operands = 0 : i64, tpu.core_type = #tpu.core_type<tc>, window_params = [{transform_indices = @transform_0, window_bounds = array<i64: 8, 16>}, {pipeline_mode = #tpu.pipeline_mode<synchronous>, transform_indices = @transform_1, window_bounds = array<i64: 16, 128>}, {pipeline_mode = #tpu.pipeline_mode<synchronous>, transform_indices = @transform_2, window_bounds = array<i64: 1, 128>}, {pipeline_mode = #tpu.pipeline_mode<synchronous>, transform_indices = @transform_3, window_bounds = array<i64: 128, 128>}, {pipeline_mode = #tpu.pipeline_mode<synchronous>, transform_indices = @transform_4, window_bounds = array<i64: 1, 128>}, {pipeline_mode = #tpu.pipeline_mode<synchronous>, transform_indices = @transform_5, window_bounds = array<i64: 128, 128>}, {pipeline_mode = #tpu.pipeline_mode<synchronous>, transform_indices = @transform_6, window_bounds = array<i64: 1, 128>}, {transform_indices = @transform_7, window_bounds = array<i64: 8, 128>}]} {
    %c0 = arith.constant 0 : index
    %c0_0 = arith.constant 0 : index
    %0 = vector.load %arg1[%c0, %c0_0] : memref<8x16xf32, #tpu.memory_space<vmem>>, vector<8x16xf32>
    %1 = arith.truncf %0 : vector<8x16xf32> to vector<8x16xbf16>
    %c0_1 = arith.constant 0 : index
    %c0_2 = arith.constant 0 : index
    %2 = vector.load %arg2[%c0_1, %c0_2] : memref<16x128xbf16, #tpu.memory_space<vmem>>, vector<16x128xbf16>
    %cst = arith.constant dense<0.000000e+00> : vector<8x128xf32>
    %3 = tpu.matmul %1, %2, %cst {dimension_numbers = #tpu.dot_dimension_numbers<[1], [0], [0], [1], [0, 0, 1, 1], [], []>} : vector<8x16xbf16>, vector<16x128xbf16>, vector<8x128xf32> -> vector<8x128xf32>
    %c0_3 = arith.constant 0 : index
    %c0_4 = arith.constant 0 : index
    %4 = vector.load %arg3[%c0_3, %c0_4] : memref<1x128xf32, #tpu.memory_space<vmem>>, vector<1x128xf32>
    %5 = vector.broadcast %4 : vector<1x128xf32> to vector<8x128xf32>
    %6 = arith.addf %3, %5 : vector<8x128xf32>
    %cst_5 = arith.constant 0.000000e+00 : f32
    %7 = vector.broadcast %cst_5 : f32 to vector<8x128xf32>
    %8 = arith.maximumf %6, %7 : vector<8x128xf32>
    %9 = arith.truncf %8 : vector<8x128xf32> to vector<8x128xbf16>
    %c0_6 = arith.constant 0 : index
    %c0_7 = arith.constant 0 : index
    %10 = vector.load %arg4[%c0_6, %c0_7] : memref<128x128xbf16, #tpu.memory_space<vmem>>, vector<128x128xbf16>
    %cst_8 = arith.constant dense<0.000000e+00> : vector<8x128xf32>
    %11 = tpu.matmul %9, %10, %cst_8 {dimension_numbers = #tpu.dot_dimension_numbers<[1], [0], [0], [1], [0, 0, 1, 1], [], []>} : vector<8x128xbf16>, vector<128x128xbf16>, vector<8x128xf32> -> vector<8x128xf32>
    %c0_9 = arith.constant 0 : index
    %c0_10 = arith.constant 0 : index
    %12 = vector.load %arg5[%c0_9, %c0_10] : memref<1x128xf32, #tpu.memory_space<vmem>>, vector<1x128xf32>
    %13 = vector.broadcast %12 : vector<1x128xf32> to vector<8x128xf32>
    %14 = arith.addf %11, %13 : vector<8x128xf32>
    %cst_11 = arith.constant 0.000000e+00 : f32
    %15 = vector.broadcast %cst_11 : f32 to vector<8x128xf32>
    %16 = arith.maximumf %14, %15 : vector<8x128xf32>
    %17 = arith.truncf %16 : vector<8x128xf32> to vector<8x128xbf16>
    %c0_12 = arith.constant 0 : index
    %c0_13 = arith.constant 0 : index
    %18 = vector.load %arg6[%c0_12, %c0_13] : memref<128x128xbf16, #tpu.memory_space<vmem>>, vector<128x128xbf16>
    %cst_14 = arith.constant dense<0.000000e+00> : vector<8x128xf32>
    %19 = tpu.matmul %17, %18, %cst_14 {dimension_numbers = #tpu.dot_dimension_numbers<[1], [0], [0], [1], [0, 0, 1, 1], [], []>} : vector<8x128xbf16>, vector<128x128xbf16>, vector<8x128xf32> -> vector<8x128xf32>
    %c0_15 = arith.constant 0 : index
    %c0_16 = arith.constant 0 : index
    %20 = vector.load %arg7[%c0_15, %c0_16] : memref<1x128xf32, #tpu.memory_space<vmem>>, vector<1x128xf32>
    %21 = vector.broadcast %20 : vector<1x128xf32> to vector<8x128xf32>
    %22 = arith.addf %19, %21 : vector<8x128xf32>
    %cst_17 = arith.constant dense<0xFF800000> : vector<8xf32>
    %23 = vector.multi_reduction <maximumf>, %22, %cst_17 [1] : vector<8x128xf32> to vector<8xf32>
    %24 = vector.shape_cast %23 : vector<8xf32> to vector<8x1xf32>
    %25 = vector.broadcast %24 : vector<8x1xf32> to vector<8x128xf32>
    %26 = arith.subf %22, %25 : vector<8x128xf32>
    %27 = math.exp %26 : vector<8x128xf32>
    %cst_18 = arith.constant dense<0.000000e+00> : vector<8xf32>
    %28 = vector.multi_reduction <add>, %27, %cst_18 [1] : vector<8x128xf32> to vector<8xf32>
    %29 = vector.shape_cast %28 : vector<8xf32> to vector<8x1xf32>
    %30 = tpu.reciprocal %29 {approx = true} : vector<8x1xf32> -> vector<8x1xf32>
    %31 = vector.broadcast %30 : vector<8x1xf32> to vector<8x128xf32>
    %32 = arith.mulf %27, %31 : vector<8x128xf32>
    %c0_19 = arith.constant 0 : index
    %c0_20 = arith.constant 0 : index
    %33 = vector.load %arg8[%c0_19, %c0_20] : memref<8x128xf32, #tpu.memory_space<vmem>>, vector<8x128xf32>
    tpu.vector_store %arg8[%c0_19, %c0_20], %32 {strides = array<i32>} : memref<8x128xf32, #tpu.memory_space<vmem>>, vector<8x128xf32>,
    return
  }
  func.func @transform_0(%arg0: i32) -> (i32, i32) {
    %c0_i32 = arith.constant 0 : i32
    %c0_i32_0 = arith.constant 0 : i32
    return %arg0, %c0_i32 : i32, i32
  }
  func.func @transform_1(%arg0: i32) -> (i32, i32) {
    %c0_i32 = arith.constant 0 : i32
    %c0_i32_0 = arith.constant 0 : i32
    %c0_i32_1 = arith.constant 0 : i32
    return %c0_i32, %c0_i32_0 : i32, i32
  }
  func.func @transform_2(%arg0: i32) -> (i32, i32) {
    %c0_i32 = arith.constant 0 : i32
    %c0_i32_0 = arith.constant 0 : i32
    %c0_i32_1 = arith.constant 0 : i32
    return %c0_i32, %c0_i32_0 : i32, i32
  }
  func.func @transform_3(%arg0: i32) -> (i32, i32) {
    %c0_i32 = arith.constant 0 : i32
    %c0_i32_0 = arith.constant 0 : i32
    %c0_i32_1 = arith.constant 0 : i32
    return %c0_i32, %c0_i32_0 : i32, i32
  }
  func.func @transform_4(%arg0: i32) -> (i32, i32) {
    %c0_i32 = arith.constant 0 : i32
    %c0_i32_0 = arith.constant 0 : i32
    %c0_i32_1 = arith.constant 0 : i32
    return %c0_i32, %c0_i32_0 : i32, i32
  }
  func.func @transform_5(%arg0: i32) -> (i32, i32) {
    %c0_i32 = arith.constant 0 : i32
    %c0_i32_0 = arith.constant 0 : i32
    %c0_i32_1 = arith.constant 0 : i32
    return %c0_i32, %c0_i32_0 : i32, i32
  }
  func.func @transform_6(%arg0: i32) -> (i32, i32) {
    %c0_i32 = arith.constant 0 : i32
    %c0_i32_0 = arith.constant 0 : i32
    %c0_i32_1 = arith.constant 0 : i32
    return %c0_i32, %c0_i32_0 : i32, i32
  }
  func.func @transform_7(%arg0: i32) -> (i32, i32) {
    %c0_i32 = arith.constant 0 : i32
    %c0_i32_0 = arith.constant 0 : i32
    return %arg0, %c0_i32 : i32, i32
  }
}

</mosaic_0001>

<bundles_post_ra>
// kernel: tpu_custom_call.1
= control target key start
LH: loop header
LB: loop body
LE: loop exit
PB: predicated region body
PF: predicated region fallthrough
CT: control target
= control target key end

     0   :  { %12 = vsyncpa [#allocation3], 0  ;;  %s722_s0 = inlined_call_operand.hbm [shape: f32[8,16], index: 0, kind: input, shape index: {}]   ;;  %s723_s1 = inlined_call_operand.hbm [shape: bf16[16,128], index: 1, kind: input, shape index: {}]   ;;  %s724_s2 = inlined_call_operand.vmem [shape: f32[1,128], index: 2, kind: input, shape index: {}]   ;;  %s725_s3 = inlined_call_operand.hbm [shape: bf16[128,128], index: 3, kind: input, shape index: {}]   ;;  %s726_s4 = inlined_call_operand.vmem [shape: f32[1,128], index: 4, kind: input, shape index: {}]   ;;  %s727_s5 = inlined_call_operand.hbm [shape: bf16[128,128], index: 5, kind: input, shape index: {}]   ;;  %s728_s6 = inlined_call_operand.vmem [shape: f32[1,128], index: 6, kind: input, shape index: {}]   ;;  %s729_s7 = inlined_call_operand.hbm [shape: f32[8,128], index: 7, kind: output, shape index: {}]  }
   0x1   :  { %13 = vsyncpa [#allocation6], 0 }
   0x2   :  { %14 = vsyncpa [#allocation9], 0 }
   0x3   :  { %15 = vsyncpa [#allocation4], 0  ;;  %s620_s24 = smov [#allocation5]  }
   0x4   :  { %s31_s25 = sshll.u32 %s620_s24, 4  ;;  %s32_s25 = int_to_ptr.vmem [resolvable:$true] %s31_s25 }
   0x5   :  { %s520_s26 = scalar_lea.vmem %s32_s25, 128  ;;  %p525_p1 = scmp.lt.s32.totalorder %s32_s25, %s32_s25 }
   0x6   :  { %p521_p0 = scmp.ne.s32.totalorder %s32_s25, %s520_s26  ;;  %p526_p2 = scmp.lt.s32.totalorder %s520_s26, %s520_s26 }
   0x8   :  { %p527_p3 = por %p526_p2, %p525_p1 }
   0xa   :  { %p528_p4 = pnand %p527_p3, %p521_p0 }
   0xc   :  { %531 = shalt.err (!%p528_p4)
}
   0xd   :  { %s621_s27 = smov 64   ;;  %s622_s28 = smov 4  }
   0xe   :  { %37 = dma.hbm_to_vmem [thread:$0]  %s723_s1, 128, %s32_s25, [#allocation6], %s621_s27, %s621_s27, %s622_s28  }
   0xf   :  { %s623_s8 = smov [#allocation2]   ;;  %s624_s10 = smov [#allocation7]  }
  0x10   :  { %s22_s9 = sshll.u32 %s623_s8, 4  ;;  %s45_s11 = sshll.u32 %s624_s10, 4  ;;  %s23_s9 = int_to_ptr.vmem [resolvable:$true] %s22_s9  ;;  %s46_s11 = int_to_ptr.vmem [resolvable:$true] %s45_s11 }
  0x11   :  { %s540_s12 = scalar_lea.vmem %s23_s9, 128  ;;  %p545_p6 = scmp.lt.s32.totalorder %s23_s9, %s23_s9 }
  0x12   :  { %p541_p5 = scmp.ne.s32.totalorder %s23_s9, %s540_s12  ;;  %p546_p7 = scmp.lt.s32.totalorder %s540_s12, %s540_s12 }
  0x14   :  { %p547_p8 = por %p546_p7, %p545_p6 }
  0x16   :  { %p548_p9 = pnand %p547_p8, %p541_p5 }
  0x18   :  { %551 = shalt.err (!%p548_p9)
}
  0x19   :  { %25 = dma.hbm_to_vmem [thread:$0]  %s722_s0, 128, %s23_s9, [#allocation3]  }
  0x1a   :  { %s560_s15 = scalar_lea.vmem %s46_s11, 1024  ;;  %p565_p11 = scmp.lt.s32.totalorder %s46_s11, %s46_s11 }
  0x1b   :  { %p561_p10 = scmp.ne.s32.totalorder %s46_s11, %s560_s15  ;;  %p566_p12 = scmp.lt.s32.totalorder %s560_s15, %s560_s15 }
  0x1d   :  { %p567_p13 = por %p566_p12, %p565_p11 }
  0x1f   :  { %p568_p0 = pnand %p567_p13, %p561_p10 }
  0x21   :  { %571 = shalt.err (!%p568_p0)
}
  0x22   :  { %51 = dma.hbm_to_vmem [thread:$0]  %s725_s3, 1024, %s46_s11, [#allocation6], %s621_s27, %s621_s27, %s622_s28  }
  0x23   :  { %s625_s17 = smov [#allocation8]  }
  0x24   :  { %s59_s18 = sshll.u32 %s625_s17, 4  ;;  %s60_s18 = int_to_ptr.vmem [resolvable:$true] %s59_s18 }
  0x25   :  { %s580_s19 = scalar_lea.vmem %s60_s18, 1024  ;;  %p585_p2 = scmp.lt.s32.totalorder %s60_s18, %s60_s18 }
  0x26   :  { %p581_p1 = scmp.ne.s32.totalorder %s60_s18, %s580_s19  ;;  %p586_p3 = scmp.lt.s32.totalorder %s580_s19, %s580_s19 }
  0x28   :  { %p587_p4 = por %p586_p3, %p585_p2 }
  0x2a   :  { %p588_p5 = pnand %p587_p4, %p581_p1 }
  0x2c   :  { %591 = shalt.err (!%p588_p5)
}
  0x2d   :  { %65 = dma.hbm_to_vmem [thread:$0]  %s727_s5, 1024, %s60_s18, [#allocation9], %s621_s27, %s621_s27, %s622_s28  }
  0x2e   :  { %612 = dma.done.wait [#allocation3], 128  }
  0x2f   :  { %613 = vsyncadd [#allocation3], 4294967168 }
  0x30   :  { %614 = dma.done.wait [#allocation6], 1152  }
  0x31   :  { %615 = vsyncadd [#allocation6], 4294966144 }
  0x32   :  { %616 = dma.done.wait [#allocation9], 1024  }
  0x33   :  { %617 = vsyncadd [#allocation9], 4294966272  ;;  %v626_v0 = vmov 0.0   ;;  %vm627_vm0 = vmmov 0   ;;  %v491_v1 = vld [vmem:[#allocation5] sm:$0xff]   ;;  %v81_v2 = vld [vmem:[#allocation2] sm:$0xff] }
  0x34   :  { %436 = vmatprep.subr.bf16.mxu0 %v626_v0  ;;  %438 = vmatprep.mubr.msk.bf16.mxu0 %vm627_vm0, %v626_v0  ;;  %v82_v3 = vpack.c.bf16 %v81_v2, %v81_v2  ;;  %vm98_vm1 = vcmask 130048   ;;  %v492_v4 = vld [vmem:[#allocation7 + $0x38] sm:$0xff]   ;;  %v493_v5 = vld [vmem:[#allocation7 + $0x30] sm:$0xff]   ;;  %v494_v6 = vld [vmem:[#allocation7 + $0x28] sm:$0xff]  }
  0x35   :  { %442 = vmatprep.subr.bf16.mxu1 %v626_v0  ;;  %458 = vmatprep.mubr.msk.bf16.mxu1 %vm627_vm0, %v626_v0  ;;  %v495_v7 = vld [vmem:[#allocation7 + $0x20] sm:$0xff]   ;;  %v496_v8 = vld [vmem:[#allocation7 + $0x18] sm:$0xff]   ;;  %v497_v9 = vld [vmem:[#allocation7 + $0x10] sm:$0xff]  }
  0x36   :  { %437 = vmatpush3.bf16.msra.mxu0 %v491_v1  ;;  %443 = vmatpush3.bf16.msra.mxu1 %v492_v4  ;;  %v498_v10 = vld [vmem:[#allocation7 + $0x8] sm:$0xff]   ;;  %v499_v11 = vld [vmem:[#allocation7] sm:$0xff]   ;;  %v500_v12 = vld [vmem:[#allocation8 + $0x38] sm:$0xff]  }
  0x37   :  { %462 = vmatprep.subr.bf16.mxu0 %v626_v0  ;;  %444 = vmatprep.subr.bf16.mxu1 %v626_v0  ;;  %v501_v13 = vld [vmem:[#allocation8 + $0x30] sm:$0xff]   ;;  %v502_v14 = vld [vmem:[#allocation8 + $0x28] sm:$0xff]   ;;  %v503_v15 = vld [vmem:[#allocation8 + $0x20] sm:$0xff]  }
  0x38   :  { %v504_v16 = vld [vmem:[#allocation8 + $0x18] sm:$0xff]   ;;  %v505_v17 = vld [vmem:[#allocation8 + $0x10] sm:$0xff]   ;;  %v506_v26 = vld [vmem:[#allocation8 + $0x8] sm:$0xff]  }
  0x39   :  { %439 = vmatmul.mubr.msk.bf16.vlgmr.msra.gmra.mxu0 %vm98_vm1, %v82_v3  ;;  %v395_v18 = vld [vmem:[%s724_s2] ss:$0 sm:$0xff]  ;;  %v507_v27 = vld [vmem:[#allocation8] sm:$0xff]  }
  0x3a   :  { %478 = vmatprep.mubr.msk.bf16.mxu0 %vm627_vm0, %v626_v0  ;;  %445 = vmatpush3.bf16.msra.mxu1 %v493_v5  ;;  %v398_v28 = vld [vmem:[%s726_s4] ss:$0 sm:$0xff]  ;;  %s628_s4 = smov [#allocation10]  }
  0x3b   :  { %446 = vmatprep.subr.bf16.mxu1 %v626_v0  ;;  %463 = vmatpush3.bf16.msra.mxu0 %v500_v12  ;;  %v407_v36 = vld [vmem:[%s728_s6] ss:$0 sm:$0xff]  ;;  %s384_s24 = sshll.u32 %s628_s4, 4  ;;  %s385_s24 = int_to_ptr.vmem [resolvable:$true] %s384_s24 }
  0x3c   :  { %464 = vmatprep.subr.bf16.mxu0 %v626_v0  ;;  %s592_s6 = scalar_lea.vmem %s385_s24, 128  ;;  %p597_p7 = scmp.lt.s32.totalorder %s385_s24, %s385_s24 }
  0x3d   :  { %p593_p6 = scmp.ne.s32.totalorder %s385_s24, %s592_s6  ;;  %p598_p8 = scmp.lt.s32.totalorder %s592_s6, %s592_s6 }
  0x3e   :  { %447 = vmatpush3.bf16.msra.mxu1 %v494_v6 }
  0x3f   :  { %448 = vmatprep.subr.bf16.mxu1 %v626_v0  ;;  %465 = vmatpush3.bf16.msra.mxu0 %v501_v13  ;;  %p599_p9 = por %p598_p8, %p597_p7 }
  0x40   :  { %466 = vmatprep.subr.bf16.mxu0 %v626_v0 }
  0x41   :  { %p600_p10 = pnand %p599_p9, %p593_p6 }
  0x42   :  { %449 = vmatpush3.bf16.msra.mxu1 %v495_v7 }
  0x43   :  { %450 = vmatprep.subr.bf16.mxu1 %v626_v0  ;;  %467 = vmatpush3.bf16.msra.mxu0 %v502_v14 }
  0x44   :  { %468 = vmatprep.subr.bf16.mxu0 %v626_v0 }
  0x46   :  { %451 = vmatpush3.bf16.msra.mxu1 %v496_v8 }
  0x47   :  { %452 = vmatprep.subr.bf16.mxu1 %v626_v0  ;;  %469 = vmatpush3.bf16.msra.mxu0 %v503_v15 }
  0x48   :  { %470 = vmatprep.subr.bf16.mxu0 %v626_v0 }
  0x4a   :  { %453 = vmatpush3.bf16.msra.mxu1 %v497_v9 }
  0x4b   :  { %454 = vmatprep.subr.bf16.mxu1 %v626_v0  ;;  %471 = vmatpush3.bf16.msra.mxu0 %v504_v16 }
  0x4c   :  { %472 = vmatprep.subr.bf16.mxu0 %v626_v0 }
  0x4e   :  { %455 = vmatpush3.bf16.msra.mxu1 %v498_v10 }
  0x4f   :  { %456 = vmatprep.subr.bf16.mxu1 %v626_v0  ;;  %473 = vmatpush3.bf16.msra.mxu0 %v505_v17 }
  0x50   :  { %474 = vmatprep.subr.bf16.mxu0 %v626_v0 }
  0x52   :  { %457 = vmatpush3.bf16.msra.mxu1 %v499_v11 }
  0x53   :  { %475 = vmatpush3.bf16.msra.mxu0 %v506_v26 }
  0x54   :  { %476 = vmatprep.subr.bf16.mxu0 %v626_v0 }
  0x57   :  { %477 = vmatpush3.bf16.msra.mxu0 %v507_v27 }
  0xf9   :  { %v136_v19 = vpop.f32.mrf.mxu0 }
  0xfa   :  { %v137_v20 = vadd.f32 %v395_v18, %v136_v19 }
  0xfb   :  { %v440_v21 = vpop.f32.mrf.mxu0 }
  0xfc   :  { %v142_v22 = vmax.f32 %v137_v20, 0.0 }
  0xfd   :  { %v139_v23 = vpop.f32.mrf.mxu0 }
  0xfe   :  { %v143_v24 = vpack.c.bf16 %v142_v22, %v142_v22 }
  0xff   :  { %v441_v25 = vpop.f32.mrf.mxu0 }
 0x100   :  { %459 = vmatmul.mubr.bf16.vlgmr.msra.gmra.mxu1 %v143_v24 }
 0x1c0   :  { %v249_v29 = vpop.f32.mrf.mxu1 }
 0x1c1   :  { %v250_v30 = vadd.f32 %v398_v28, %v249_v29 }
 0x1c2   :  { %v460_v31 = vpop.f32.mrf.mxu1 }
 0x1c3   :  { %v255_v32 = vmax.f32 %v250_v30, 0.0 }
 0x1c4   :  { %v252_v33 = vpop.f32.mrf.mxu1 }
 0x1c5   :  { %v256_v34 = vpack.c.bf16 %v255_v32, %v255_v32 }
 0x1c6   :  { %v461_v35 = vpop.f32.mrf.mxu1 }
 0x1c7   :  { %479 = vmatmul.mubr.bf16.vlgmr.msra.gmra.mxu0 %v256_v34 }
 0x287   :  { %v362_v37 = vpop.f32.mrf.mxu0 }
 0x288   :  { %v363_v38 = vadd.f32 %v407_v36, %v362_v37 }
 0x289   :  { %v480_v39 = vpop.f32.mrf.mxu0 }
 0x28a   :  { %368 = vmax.xlane.f32.xlu0 %v363_v38 }
 0x28b   :  { %v365_v40 = vpop.f32.mrf.mxu0 }
 0x28d   :  { %v481_v41 = vpop.f32.mrf.mxu0 }
 0x313   :  { %v369_v42 = vpop.xlane.xlu0 %368 }
 0x314   :  { %v370_v43 = vsub.f32 %v363_v38, %v369_v42 }
 0x316   :  { %v371_v44 = vmul.f32 1.442695, %v370_v43 }
 0x318   :  { %508 = vpow2.f32 %v371_v44 }
 0x325   :  { %v509_v45 = vpop.eup %508 }
 0x326   :  { %373 = vadd.xlane.f32.xlu0 %v509_v45 }
 0x3af   :  { %v374_v46 = vpop.xlane.xlu0 %373 }
 0x3b0   :  { %510 = vrcp.f32 %v374_v46 }
 0x3bd   :  { %v511_v47 = vpop.eup %510 }
 0x3be   :  { %v376_v48 = vmul.f32 %v511_v47, %v509_v45 }
 0x3c0   :  { %377 = vst [vmem:[#allocation10] sm:$0xff] %v376_v48 }
 0x3c1   :  { %603 = shalt.err (!%p600_p10)
}
 0x3c2   :  { %387 = dma.vmem_to_hbm [thread:$0]  %s385_s24, 128, %s729_s7, [#allocation4]  }
 0x3c3   :  { %618 = dma.done.wait [#allocation4], 128  }
 0x3c4   :  { %619 = vsyncadd [#allocation4], 4294967168 }
 0x3c5   :  { %391 = vsyncpa [#allocation3], 1 }
 0x3c6   :  { %392 = vsyncpa [#allocation6], 1 }
 0x3c7   :  { %393 = vsyncpa [#allocation9], 1 }
 0x3c8   :  { %394 = vsyncpa [#allocation4], 1 }

</bundles_post_ra>
